<compile_context>
chip_gen: v7x
topology: tpu7x:2x2x1
jax: 0.10.0
libtpu: 0.0.40
codegen_flags: <defaults>
</compile_context>

<pallas_src>
import jax
import jax.numpy as jnp
from jax.experimental import pallas as pl
from jax.experimental.pallas import tpu as pltpu


def _round_up(x, m):
    return (x + m - 1) // m * m


def _gated_kernel(x_ref, wg_ref, bg_ref, wp_ref, bp_ref, o_ref,
                  accg_ref, accp_ref):
    k = pl.program_id(2)

    @pl.when(k == 0)
    def _init():
        accg_ref[...] = jnp.zeros_like(accg_ref)
        accp_ref[...] = jnp.zeros_like(accp_ref)

    # Cast the x tile to the weight dtype in-register (hides under MXU/DMA);
    # both GEMMs accumulate in f32.
    xb = x_ref[...].astype(wg_ref.dtype)
    accg_ref[...] += jnp.dot(xb, wg_ref[...], preferred_element_type=jnp.float32)
    accp_ref[...] += jnp.dot(xb, wp_ref[...], preferred_element_type=jnp.float32)

    @pl.when(k == pl.num_programs(2) - 1)
    def _finalize():
        # Epilogue in f32 (v5e VPU/EUP have no bf16 path); sigmoid's exp runs
        # on the EUP slot, relu/mul on the VPU -> both hidden under the MXU.
        g = jax.nn.sigmoid(accg_ref[...] + bg_ref[...])
        h = jnp.maximum(accp_ref[...] + bp_ref[...], 0.0)
        o_ref[...] = (g * h).astype(o_ref.dtype)


def gated_mechanism(x, w_gate, b_gate, w_proj, b_proj, *,
                    compute_dtype=jnp.bfloat16, tm=256, tn=512, max_tk=2048):
    """
    x:       [B, D_in]           (any float dtype; output matches x.dtype)
    w_gate:  [D_out, D_in]       (PyTorch nn.Linear weight layout)
    b_gate:  [D_out]
    w_proj:  [D_out, D_in]
    b_proj:  [D_out]
    returns: [B, D_out]
    """
    B, D_in = x.shape
    D_out = w_gate.shape[0]
    out_dtype = x.dtype

    # Lane-dense per-branch output width.
    Dp = _round_up(D_out, 128)

    # ---- tile plan -------------------------------------------------------
    # tm: 256 fills the v6e/v7x MXU rows; for small B use the exact batch
    # (block == full array dim, so no (8,128) constraint and no padding).
    tm = min(tm, B)
    # tn per branch (gate and proj each load a (tk, tn) tile per step);
    # must divide Dp (Dp is a multiple of 128, so this terminates at 128).
    tn = min(tn, Dp)
    while Dp % tn:
        tn -= 128
    # tk: single K step unless D_in is large; when tiling, pick a divisor of
    # D_in that is a multiple of 128 (keeps x un-padded along K).
    if D_in > max_tk and D_in % 128 == 0:
        tk = max(t for t in range(128, max_tk + 1, 128) if D_in % t == 0)
    else:
        tk = D_in  # block == full dim -> always legal

    grid = (pl.cdiv(B, tm), Dp // tn, D_in // tk)

    # ---- parameter packing (one-time, tiny vs. x traffic) ----------------
    def _prep_w(w):  # [D_out, D_in] -> [D_in, Dp], zero-padded cols, bf16
        return jnp.pad(w.T, ((0, 0), (0, Dp - D_out))).astype(compute_dtype)

    def _prep_b(b):  # [D_out] -> [1, Dp] f32
        return jnp.pad(b.astype(jnp.float32), (0, Dp - D_out)).reshape(1, Dp)

    wg_p, wp_p = _prep_w(w_gate), _prep_w(w_proj)
    bg_p, bp_p = _prep_b(b_gate), _prep_b(b_proj)

    # ---- VMEM budget (counts real double-buffered allocations) -----------
    x_isz = jnp.dtype(x.dtype).itemsize
    o_isz = jnp.dtype(out_dtype).itemsize
    w_isz = jnp.dtype(compute_dtype).itemsize
    vmem_need = (2 * tm * tk * x_isz          # x tile, double-buffered
                 + 2 * 2 * tk * tn * w_isz    # gate+proj weight tiles, 2-buf
                 + 2 * 2 * tn * 4             # bias tiles, 2-buf
                 + 2 * tm * tn * o_isz        # out tile, 2-buf
                 + 2 * tm * tn * 4)           # two f32 scratch accumulators
    try:
        vmem_cap = int(pltpu.get_tpu_info().vmem_capacity_bytes)
    except Exception:
        vmem_cap = 64 << 20                   # conservative (v7x) fallback
    usable = vmem_cap * 7 // 8                # ~112 MiB v5e/v6e, ~56 MiB v7x
    vmem_limit = int(min(usable, max(vmem_need + (8 << 20), 32 << 20)))

    # ---- advisory cost estimate for the XLA scheduler ---------------------
    cost = pl.CostEstimate(
        flops=4 * B * D_in * Dp,                       # two GEMMs
        transcendentals=B * Dp,                        # sigmoid exp
        bytes_accessed=(B * D_in * x_isz
                        + 2 * D_in * Dp * w_isz
                        + 2 * Dp * 4
                        + B * Dp * o_isz),
    )

    out = pl.pallas_call(
        _gated_kernel,
        out_shape=jax.ShapeDtypeStruct((B, Dp), out_dtype),
        grid_spec=pltpu.PrefetchScalarGridSpec(
            num_scalar_prefetch=0,
            grid=grid,
            in_specs=[
                pl.BlockSpec((tm, tk), lambda i, j, k: (i, k)),   # x
                pl.BlockSpec((tk, tn), lambda i, j, k: (k, j)),   # W_gate^T
                pl.BlockSpec((1, tn),  lambda i, j, k: (0, j)),   # b_gate
                pl.BlockSpec((tk, tn), lambda i, j, k: (k, j)),   # W_proj^T
                pl.BlockSpec((1, tn),  lambda i, j, k: (0, j)),   # b_proj
            ],
            out_specs=pl.BlockSpec((tm, tn), lambda i, j, k: (i, j)),
            scratch_shapes=[pltpu.VMEM((tm, tn), jnp.float32),
                            pltpu.VMEM((tm, tn), jnp.float32)],
        ),
        compiler_params=pltpu.CompilerParams(
            # M and N independent -> megacore sharding even when the batch
            # grid is short; K is the reduction axis.
            dimension_semantics=("parallel", "parallel", "arbitrary"),
            vmem_limit_bytes=vmem_limit,
        ),
        cost_estimate=cost,
    )(x, wg_p, bg_p, wp_p, bp_p)

    # Rows are exact (out_shape uses B); trim padded columns only if needed.
    return out if Dp == D_out else out[:, :D_out]


if __name__ == "__main__":
    key = jax.random.PRNGKey(0)
    B, D_in, D_out = 8, 32, 64

    k_x, k_wg, k_bg, k_wp, k_bp = jax.random.split(key, 5)
    x = jax.random.normal(k_x, (B, D_in), dtype=jnp.float32)

    # nn.Linear-style parameters: weight [out, in], bias [out].
    bound = 1.0 / jnp.sqrt(D_in)
    w_gate = jax.random.uniform(k_wg, (D_out, D_in), jnp.float32, -bound, bound)
    b_gate = jax.random.uniform(k_bg, (D_out,), jnp.float32, -bound, bound)
    w_proj = jax.random.uniform(k_wp, (D_out, D_in), jnp.float32, -bound, bound)
    b_proj = jax.random.uniform(k_bp, (D_out,), jnp.float32, -bound, bound)

    out = jax.jit(gated_mechanism)(x, w_gate, b_gate, w_proj, b_proj)
    out = jax.block_until_ready(out)

    # Reference in plain f32 JAX (same math as the PyTorch module).
    g_ref = jax.nn.sigmoid(x @ w_gate.T + b_gate)
    h_ref = jnp.maximum(x @ w_proj.T + b_proj, 0.0)
    ref = g_ref * h_ref

    assert out.shape == (B, D_out)
    # bf16 matmul inputs with f32 accumulation -> loosen tolerance vs f32 ref.
    assert jnp.allclose(out, ref, atol=5e-2, rtol=5e-2), "mismatch vs reference"

    # Note: at this toy shape the kernel is pure launch/DMA overhead; the
    # tiled design pays off at production B / D_in / D_out.
    print("KERNEL_OK")
</pallas_src>

<mosaic_0001>
module attributes {stable_mosaic.version = 11 : i64} {
  func.func @_gated_kernel(%arg0: i32, %arg1: i32, %arg2: i32, %arg3: memref<8x32xf32, #tpu.memory_space<vmem>>, %arg4: memref<32x128xbf16, #tpu.memory_space<vmem>>, %arg5: memref<1x128xf32, #tpu.memory_space<vmem>>, %arg6: memref<32x128xbf16, #tpu.memory_space<vmem>>, %arg7: memref<1x128xf32, #tpu.memory_space<vmem>>, %arg8: memref<8x128xf32, #tpu.memory_space<vmem>>, %arg9: memref<8x128xf32, #tpu.memory_space<vmem>>, %arg10: memref<8x128xf32, #tpu.memory_space<vmem>>) attributes {dimension_semantics = [#tpu.dimension_semantics<parallel>, #tpu.dimension_semantics<parallel>, #tpu.dimension_semantics<arbitrary>], iteration_bounds = array<i64: 1, 1, 1>, scalar_prefetch = 0 : i64, scratch_operands = 2 : i64, tpu.core_type = #tpu.core_type<tc>, window_params = [{transform_indices = @transform_0, window_bounds = array<i64: 8, 32>}, {transform_indices = @transform_1, window_bounds = array<i64: 32, 128>}, {transform_indices = @transform_2, window_bounds = array<i64: 1, 128>}, {transform_indices = @transform_3, window_bounds = array<i64: 32, 128>}, {transform_indices = @transform_4, window_bounds = array<i64: 1, 128>}, {transform_indices = @transform_5, window_bounds = array<i64: 8, 128>}]} {
    %c0_i32 = arith.constant 0 : i32
    %0 = arith.cmpi eq, %arg2, %c0_i32 : i32
    %1 = arith.extui %0 : i1 to i32
    %c0_i32_0 = arith.constant 0 : i32
    %2 = arith.cmpi ne, %1, %c0_i32_0 : i32
    scf.if %2 {
      %cst_17 = arith.constant 0.000000e+00 : f32
      %18 = vector.broadcast %cst_17 : f32 to vector<8x128xf32>
      %c0_18 = arith.constant 0 : index
      %c0_19 = arith.constant 0 : index
      %19 = vector.load %arg9[%c0_18, %c0_19] : memref<8x128xf32, #tpu.memory_space<vmem>>, vector<8x128xf32>
      tpu.vector_store %arg9[%c0_18, %c0_19], %18 {strides = array<i32>} : memref<8x128xf32, #tpu.memory_space<vmem>>, vector<8x128xf32>,
      %cst_20 = arith.constant 0.000000e+00 : f32
      %20 = vector.broadcast %cst_20 : f32 to vector<8x128xf32>
      %c0_21 = arith.constant 0 : index
      %c0_22 = arith.constant 0 : index
      %21 = vector.load %arg10[%c0_21, %c0_22] : memref<8x128xf32, #tpu.memory_space<vmem>>, vector<8x128xf32>
      tpu.vector_store %arg10[%c0_21, %c0_22], %20 {strides = array<i32>} : memref<8x128xf32, #tpu.memory_space<vmem>>, vector<8x128xf32>,
    } else {
    }
    %c0 = arith.constant 0 : index
    %c0_1 = arith.constant 0 : index
    %3 = vector.load %arg3[%c0, %c0_1] : memref<8x32xf32, #tpu.memory_space<vmem>>, vector<8x32xf32>
    %4 = arith.truncf %3 : vector<8x32xf32> to vector<8x32xbf16>
    %c0_2 = arith.constant 0 : index
    %c0_3 = arith.constant 0 : index
    %5 = vector.load %arg9[%c0_2, %c0_3] : memref<8x128xf32, #tpu.memory_space<vmem>>, vector<8x128xf32>
    %c0_4 = arith.constant 0 : index
    %c0_5 = arith.constant 0 : index
    %6 = vector.load %arg4[%c0_4, %c0_5] : memref<32x128xbf16, #tpu.memory_space<vmem>>, vector<32x128xbf16>
    %cst = arith.constant dense<0.000000e+00> : vector<8x128xf32>
    %7 = tpu.matmul %4, %6, %cst {dimension_numbers = #tpu.dot_dimension_numbers<[1], [0], [0], [1], [0, 0, 1, 1], [], []>} : vector<8x32xbf16>, vector<32x128xbf16>, vector<8x128xf32> -> vector<8x128xf32>
    %8 = arith.addf %5, %7 : vector<8x128xf32>
    %c0_6 = arith.constant 0 : index
    %c0_7 = arith.constant 0 : index
    %9 = vector.load %arg9[%c0_6, %c0_7] : memref<8x128xf32, #tpu.memory_space<vmem>>, vector<8x128xf32>
    tpu.vector_store %arg9[%c0_6, %c0_7], %8 {strides = array<i32>} : memref<8x128xf32, #tpu.memory_space<vmem>>, vector<8x128xf32>,
    %c0_8 = arith.constant 0 : index
    %c0_9 = arith.constant 0 : index
    %10 = vector.load %arg10[%c0_8, %c0_9] : memref<8x128xf32, #tpu.memory_space<vmem>>, vector<8x128xf32>
    %c0_10 = arith.constant 0 : index
    %c0_11 = arith.constant 0 : index
    %11 = vector.load %arg6[%c0_10, %c0_11] : memref<32x128xbf16, #tpu.memory_space<vmem>>, vector<32x128xbf16>
    %cst_12 = arith.constant dense<0.000000e+00> : vector<8x128xf32>
    %12 = tpu.matmul %4, %11, %cst_12 {dimension_numbers = #tpu.dot_dimension_numbers<[1], [0], [0], [1], [0, 0, 1, 1], [], []>} : vector<8x32xbf16>, vector<32x128xbf16>, vector<8x128xf32> -> vector<8x128xf32>
    %13 = arith.addf %10, %12 : vector<8x128xf32>
    %c0_13 = arith.constant 0 : index
    %c0_14 = arith.constant 0 : index
    %14 = vector.load %arg10[%c0_13, %c0_14] : memref<8x128xf32, #tpu.memory_space<vmem>>, vector<8x128xf32>
    tpu.vector_store %arg10[%c0_13, %c0_14], %13 {strides = array<i32>} : memref<8x128xf32, #tpu.memory_space<vmem>>, vector<8x128xf32>,
    %c0_i32_15 = arith.constant 0 : i32
    %15 = arith.cmpi eq, %arg2, %c0_i32_15 : i32
    %16 = arith.extui %15 : i1 to i32
    %c0_i32_16 = arith.constant 0 : i32
    %17 = arith.cmpi ne, %16, %c0_i32_16 : i32
    scf.if %17 {
      %c0_17 = arith.constant 0 : index
      %c0_18 = arith.constant 0 : index
      %18 = vector.load %arg9[%c0_17, %c0_18] : memref<8x128xf32, #tpu.memory_space<vmem>>, vector<8x128xf32>
      %c0_19 = arith.constant 0 : index
      %c0_20 = arith.constant 0 : index
      %19 = vector.load %arg5[%c0_19, %c0_20] : memref<1x128xf32, #tpu.memory_space<vmem>>, vector<1x128xf32>
      %20 = vector.broadcast %19 : vector<1x128xf32> to vector<8x128xf32>
      %21 = arith.addf %18, %20 : vector<8x128xf32>
      %22 = arith.negf %21 : vector<8x128xf32>
      %23 = math.exp %22 : vector<8x128xf32>
      %cst_21 = arith.constant 1.000000e+00 : f32
      %24 = vector.broadcast %cst_21 : f32 to vector<8x128xf32>
      %25 = arith.addf %24, %23 : vector<8x128xf32>
      %26 = arith.divf %24, %25 : vector<8x128xf32>
      %c0_22 = arith.constant 0 : index
      %c0_23 = arith.constant 0 : index
      %27 = vector.load %arg10[%c0_22, %c0_23] : memref<8x128xf32, #tpu.memory_space<vmem>>, vector<8x128xf32>
      %c0_24 = arith.constant 0 : index
      %c0_25 = arith.constant 0 : index
      %28 = vector.load %arg7[%c0_24, %c0_25] : memref<1x128xf32, #tpu.memory_space<vmem>>, vector<1x128xf32>
      %29 = vector.broadcast %28 : vector<1x128xf32> to vector<8x128xf32>
      %30 = arith.addf %27, %29 : vector<8x128xf32>
      %cst_26 = arith.constant 0.000000e+00 : f32
      %31 = vector.broadcast %cst_26 : f32 to vector<8x128xf32>
      %32 = arith.maximumf %30, %31 : vector<8x128xf32>
      %33 = arith.mulf %26, %32 : vector<8x128xf32>
      %c0_27 = arith.constant 0 : index
      %c0_28 = arith.constant 0 : index
      %34 = vector.load %arg8[%c0_27, %c0_28] : memref<8x128xf32, #tpu.memory_space<vmem>>, vector<8x128xf32>
      tpu.vector_store %arg8[%c0_27, %c0_28], %33 {strides = array<i32>} : memref<8x128xf32, #tpu.memory_space<vmem>>, vector<8x128xf32>,
    } else {
    }
    return
  }
  func.func @transform_0(%arg0: i32, %arg1: i32, %arg2: i32) -> (i32, i32) {
    %c0_i32 = arith.constant 0 : i32
    return %arg0, %arg2 : i32, i32
  }
  func.func @transform_1(%arg0: i32, %arg1: i32, %arg2: i32) -> (i32, i32) {
    %c0_i32 = arith.constant 0 : i32
    return %arg2, %arg1 : i32, i32
  }
  func.func @transform_2(%arg0: i32, %arg1: i32, %arg2: i32) -> (i32, i32) {
    %c0_i32 = arith.constant 0 : i32
    %c0_i32_0 = arith.constant 0 : i32
    return %c0_i32, %arg1 : i32, i32
  }
  func.func @transform_3(%arg0: i32, %arg1: i32, %arg2: i32) -> (i32, i32) {
    %c0_i32 = arith.constant 0 : i32
    return %arg2, %arg1 : i32, i32
  }
  func.func @transform_4(%arg0: i32, %arg1: i32, %arg2: i32) -> (i32, i32) {
    %c0_i32 = arith.constant 0 : i32
    %c0_i32_0 = arith.constant 0 : i32
    return %c0_i32, %arg1 : i32, i32
  }
  func.func @transform_5(%arg0: i32, %arg1: i32, %arg2: i32) -> (i32, i32) {
    %c0_i32 = arith.constant 0 : i32
    return %arg0, %arg1 : i32, i32
  }
}

</mosaic_0001>

<bundles_post_ra>
// kernel: gated_mechanism.1
= control target key start
LH: loop header
LB: loop body
LE: loop exit
PB: predicated region body
PF: predicated region fallthrough
CT: control target
= control target key end

     0   :  { %v262_v1 = vmov 0.0   ;;  %vm263_vm0 = vmmov 0   ;;  %s328_s0 = inlined_call_operand.vmem [shape: f32[8,32], index: 0, kind: input, shape index: {}]   ;;  %s329_s1 = inlined_call_operand.vmem [shape: bf16[32,128], index: 1, kind: input, shape index: {}]   ;;  %s330_s2 = inlined_call_operand.vmem [shape: f32[1,128], index: 2, kind: input, shape index: {}]   ;;  %s331_s3 = inlined_call_operand.vmem [shape: bf16[32,128], index: 3, kind: input, shape index: {}]   ;;  %s332_s4 = inlined_call_operand.vmem [shape: f32[1,128], index: 4, kind: input, shape index: {}]   ;;  %s333_s5 = inlined_call_operand.hbm [shape: f32[8,128], index: 5, kind: output, shape index: {}]  }
   0x1   :  { %v230_v0 = vld [vmem:[%s329_s1] sm:$0xff]   ;;  %211 = vmatprep.subr.bf16.mxu0 %v262_v1  ;;  %v231_v2 = vld [vmem:[%s329_s1 + $0x8] sm:$0xff]   ;;  %219 = vmatprep.subr.bf16.mxu1 %v262_v1 }
   0x2   :  { %212 = vmatpush3.bf16.msra.mxu0 %v230_v0  ;;  %215 = vmatprep.mubr.msk.bf16.mxu0 %vm263_vm0, %v262_v1  ;;  %v28_v3 = vld [vmem:[%s328_s0] sm:$0xff] }
   0x3   :  { %213 = vmatprep.subr.bf16.mxu0 %v262_v1  ;;  %v232_v4 = vld [vmem:[%s331_s3] sm:$0xff]   ;;  %223 = vmatprep.mubr.msk.bf16.mxu1 %vm263_vm0, %v262_v1 }
   0x4   :  { %10 = vsyncpa [#allocation5], 0  ;;  %v29_v5 = vpack.c.bf16 %v28_v3, %v28_v3  ;;  %220 = vmatpush3.bf16.msra.mxu1 %v232_v4  ;;  %v233_v6 = vld [vmem:[%s331_s3 + $0x8] sm:$0xff]   ;;  %vm47_vm1 = vcmask 261120   ;;  %v202_v7 = vld [vmem:[%s330_s2] ss:$0 sm:$0xff] }
   0x5   :  { %221 = vmatprep.subr.bf16.mxu1 %v262_v1  ;;  %v204_v20 = vld [vmem:[%s332_s4] ss:$0 sm:$0xff]  ;;  %s264_s2 = smov [#allocation4]  }
   0x6   :  { %214 = vmatpush3.bf16.msra.mxu0 %v231_v2  ;;  %s188_s29 = sshll.u32 %s264_s2, 4  ;;  %s189_s29 = int_to_ptr.vmem [resolvable:$true] %s188_s29 }
   0x7   :  { %s238_s30 = scalar_lea.vmem %s189_s29, 128  ;;  %p243_p1 = scmp.lt.s32.totalorder %s189_s29, %s189_s29 }
   0x8   :  { %222 = vmatpush3.bf16.msra.mxu1 %v233_v6  ;;  %p239_p0 = scmp.ne.s32.totalorder %s189_s29, %s238_s30  ;;  %p244_p2 = scmp.lt.s32.totalorder %s238_s30, %s238_s30 }
   0x9   :  { %216 = vmatmul.mubr.msk.bf16.vlgmr.msra.gmra.mrb[0].mxu0 %vm47_vm1, %v29_v5 }
   0xa   :  { %p245_p3 = por %p244_p2, %p243_p1 }
   0xb   :  { %224 = vmatmul.mubr.msk.bf16.vlgmr.msra.gmra.mrb[0].mxu1 %vm47_vm1, %v29_v5 }
   0xc   :  { %p246_p4 = pnand %p245_p3, %p239_p0 }
  0xdc   :  { %v85_v8 = vpop.f32.mrb[0].mxu0 }
  0xdd   :  { %v163_v9 = vadd.f32 %v202_v7, %v85_v8  ;;  %v217_v10 = vpop.f32.mrb[1].mxu0 }
  0xde   :  { %v88_v11 = vpop.f32.mrb[2].mxu0  ;;  %v144_v14 = vpop.f32.mrb[0].mxu1 }
  0xdf   :  { %v203_v12 = vmul.f32 -1.442695, %v163_v9  ;;  %v218_v13 = vpop.f32.mrb[3].mxu0  ;;  %v225_v15 = vpop.f32.mrb[1].mxu1  ;;  %v178_v21 = vadd.f32 %v204_v20, %v144_v14 }
  0xe0   :  { %v147_v16 = vpop.f32.mrb[2].mxu1 }
  0xe1   :  { %234 = vpow2.f32 %v203_v12  ;;  %v226_v17 = vpop.f32.mrb[3].mxu1  ;;  %v179_v22 = vmax.f32 %v178_v21, 0.0 }
  0xeb   :  { %v235_v18 = vpop.eup %234 }
  0xec   :  { %v167_v19 = vadd.f32 1.0, %v235_v18 }
  0xee   :  { %236 = vrcp.f32 %v167_v19 }
  0xf8   :  { %v237_v23 = vpop.eup %236 }
  0xf9   :  { %v180_v24 = vmul.f32 %v237_v23, %v179_v22 }
  0xfb   :  { %181 = vst [vmem:[#allocation4] sm:$0xff] %v180_v24 }
  0xfc   :  { %249 = shalt.err (!%p246_p4)
}
  0xfd   :  { %s250_s8 = scalar_lea.hbm %s333_s5, 128 }
  0xfe   :  { %p251_p5 = scmp.ne.s32.totalorder %s333_s5, %s250_s8  ;;  %p254_p6 = scmp.lt.u32.totalorder %s250_s8, %s333_s5 }
 0x100   :  { %p256_p7 = pnand %p254_p6, %p251_p5 }
 0x102   :  { %259 = shalt.err (!%p256_p7)
}
 0x103   :  { %191 = dma.vmem_to_hbm [thread:$0]  %s189_s29, 128, %s333_s5, [#allocation5]  }
 0x104   :  { %260 = dma.done.wait [#allocation5], 128  }
 0x105   :  { %261 = vsyncadd [#allocation5], 4294967168 }
 0x106   :  { %195 = vsyncpa [#allocation5], 1 }

</bundles_post_ra>
